<compile_context>
chip_gen: v7x
topology: tpu7x:2x2x1
jax: 0.10.0
libtpu: 0.0.40
codegen_flags: <defaults>
</compile_context>

<pallas_src>
import functools

import jax
import jax.numpy as jnp
from jax.experimental import pallas as pl
from jax.experimental.pallas import tpu as pltpu

LN_EPS = 1e-5  # torch.nn.LayerNorm default


def _round_up(x, m):
    return ((x + m - 1) // m) * m


def _dense_kernel(x_ref, w_ref, b_ref, g_ref, beta_ref, o_ref, acc_ref,
                  *, out_features):
    # x_ref:    (TM, TK)       input rows, K-slice
    # w_ref:    (F_pad, TK)    torch-layout weight, K-slice
    # b_ref:    (1, F_pad)     linear bias (zero in padded lanes)
    # g_ref:    (1, F_pad)     layernorm gamma (zero in padded lanes)
    # beta_ref: (1, F_pad)     layernorm beta (zero in padded lanes)
    # o_ref:    (TM, F_pad)    output tile
    # acc_ref:  (TM, F_pad)    f32 accumulator scratch
    k = pl.program_id(1)

    @pl.when(k == 0)
    def _init():
        # Fold the linear bias into the accumulator init.
        acc_ref[...] = jnp.broadcast_to(
            b_ref[...].astype(jnp.float32), acc_ref.shape)

    # Partial matmul in the operands' native dtype, f32 accumulation.
    # Contraction: x (TM, TK) . w (F_pad, TK) over TK  ->  (TM, F_pad)
    acc_ref[...] += jax.lax.dot_general(
        x_ref[...], w_ref[...],
        dimension_numbers=(((1,), (1,)), ((), ())),
        preferred_element_type=jnp.float32,
    )

    @pl.when(k == pl.num_programs(1) - 1)
    def _epilogue():
        y = acc_ref[...]                         # (TM, F_pad) f32
        f_pad = y.shape[-1]
        inv_n = jnp.float32(1.0 / out_features)

        # Padded lanes of y are exactly 0 (zero weight rows + zero bias),
        # so the plain sum already equals the sum over the true features.
        mean = jnp.sum(y, axis=-1, keepdims=True) * inv_n
        centered = y - mean
        if f_pad != out_features:
            # Mask padded lanes before the variance (they hold -mean).
            lane = jax.lax.broadcasted_iota(jnp.int32, centered.shape, 1)
            centered_sq = jnp.where(lane < out_features, centered, 0.0)
        else:
            centered_sq = centered
        var = jnp.sum(centered_sq * centered_sq, axis=-1, keepdims=True) * inv_n

        y_norm = centered * jax.lax.rsqrt(var + LN_EPS)
        y_norm = (y_norm * g_ref[...].astype(jnp.float32)
                  + beta_ref[...].astype(jnp.float32))

        # Activation: relu.  Dropout(None) -> identity (eval mode).
        o_ref[...] = jnp.maximum(y_norm, 0.0).astype(o_ref.dtype)


@functools.partial(jax.jit, static_argnames=("row_tile", "k_tile"))
def dense_forward(x, weight, bias, gamma, beta, *, row_tile=256, k_tile=512):
    """x: (*, in_features); weight: (out_features, in_features) (torch layout)."""
    in_features = x.shape[-1]
    out_features = weight.shape[0]
    lead_shape = x.shape[:-1]

    x2 = x.reshape(-1, in_features)
    n = x2.shape[0]

    # ---- static tile / padding plan (all shapes are compile-time) ----
    f_pad = _round_up(out_features, 128)          # lane-dense output
    k_pad = _round_up(in_features, 128)           # lane-dense K
    tk = min(k_tile, k_pad)
    k_pad = _round_up(k_pad, tk)                  # make K divisible by tk
    tm = min(row_tile, _round_up(n, 8))           # sublane-aligned row tile
    n_tot = _round_up(n, tm)

    # ---- pad operands (no-op when already aligned) ----
    if x2.shape != (n_tot, k_pad):
        x2 = jnp.pad(x2, ((0, n_tot - n), (0, k_pad - in_features)))
    w = weight
    if w.shape != (f_pad, k_pad):
        w = jnp.pad(w, ((0, f_pad - out_features), (0, k_pad - in_features)))

    def _pad_vec(v):
        v = v.reshape(1, out_features)
        if f_pad != out_features:
            v = jnp.pad(v, ((0, 0), (0, f_pad - out_features)))
        return v

    b2, g2, be2 = _pad_vec(bias), _pad_vec(gamma), _pad_vec(beta)

    grid = (n_tot // tm, k_pad // tk)
    kernel = functools.partial(_dense_kernel, out_features=out_features)

    out = pl.pallas_call(
        kernel,
        out_shape=jax.ShapeDtypeStruct((n_tot, f_pad), x.dtype),
        grid_spec=pltpu.PrefetchScalarGridSpec(
            num_scalar_prefetch=0,
            grid=grid,
            in_specs=[
                pl.BlockSpec((tm, tk), lambda i, k: (i, k)),        # x
                pl.BlockSpec((f_pad, tk), lambda i, k: (0, k)),     # weight
                pl.BlockSpec((1, f_pad), lambda i, k: (0, 0)),      # bias
                pl.BlockSpec((1, f_pad), lambda i, k: (0, 0)),      # gamma
                pl.BlockSpec((1, f_pad), lambda i, k: (0, 0)),      # beta
            ],
            out_specs=pl.BlockSpec((tm, f_pad), lambda i, k: (i, 0)),
            scratch_shapes=[pltpu.VMEM((tm, f_pad), jnp.float32)],
        ),
        compiler_params=pltpu.CompilerParams(
            dimension_semantics=("parallel", "arbitrary"),
            vmem_limit_bytes=48 * 1024 * 1024,   # headroom on v7x's 64 MiB
        ),
    )(x2, w, b2, g2, be2)

    out = out[:n, :out_features]
    return out.reshape(*lead_shape, out_features)


def init_dense_params(key, in_features, out_features, dtype=jnp.float32):
    """Deterministic init mirroring torch.nn.Linear / LayerNorm defaults."""
    k_w, k_b = jax.random.split(key)
    bound = 1.0 / (in_features ** 0.5)
    weight = jax.random.uniform(
        k_w, (out_features, in_features), dtype, minval=-bound, maxval=bound
    )
    bias = jax.random.uniform(
        k_b, (out_features,), dtype, minval=-bound, maxval=bound
    )
    gamma = jnp.ones((out_features,), dtype)
    beta = jnp.zeros((out_features,), dtype)
    return weight, bias, gamma, beta


def _reference(x, weight, bias, gamma, beta):
    y = jnp.einsum("...i,oi->...o", x, weight,
                   precision=jax.lax.Precision.HIGHEST) + bias
    mean = jnp.mean(y, axis=-1, keepdims=True)
    var = jnp.mean((y - mean) ** 2, axis=-1, keepdims=True)
    y = (y - mean) / jnp.sqrt(var + LN_EPS)
    y = y * gamma + beta
    return jnp.maximum(y, 0.0)


if __name__ == "__main__":
    key = jax.random.PRNGKey(0)
    k_x, k_p = jax.random.split(key)

    batch, seq = 2, 8
    in_features, out_features = 32, 32

    x = jax.random.normal(k_x, (batch, seq, in_features), jnp.float32)
    weight, bias, gamma, beta = init_dense_params(k_p, in_features, out_features)

    out = dense_forward(x, weight, bias, gamma, beta)
    out = jax.block_until_ready(out)

    ref = _reference(x, weight, bias, gamma, beta)
    assert out.shape == (batch, seq, out_features)
    assert jnp.allclose(out, ref, atol=2e-5, rtol=2e-5)

    # TODO(synk): training-mode dropout (pltpu.prng_*) and the monotonic=True
    # path (|W| @ x) are not implemented; module defaults use neither.
    print("KERNEL_OK")
</pallas_src>

<mosaic_0001>
module attributes {stable_mosaic.version = 11 : i64} {
  func.func @_dense_kernel(%arg0: i32, %arg1: i32, %arg2: memref<16x128xf32, #tpu.memory_space<vmem>>, %arg3: memref<128x128xf32, #tpu.memory_space<vmem>>, %arg4: memref<1x128xf32, #tpu.memory_space<vmem>>, %arg5: memref<1x128xf32, #tpu.memory_space<vmem>>, %arg6: memref<1x128xf32, #tpu.memory_space<vmem>>, %arg7: memref<16x128xf32, #tpu.memory_space<vmem>>, %arg8: memref<16x128xf32, #tpu.memory_space<vmem>>) attributes {dimension_semantics = [#tpu.dimension_semantics<parallel>, #tpu.dimension_semantics<arbitrary>], iteration_bounds = array<i64: 1, 1>, scalar_prefetch = 0 : i64, scratch_operands = 1 : i64, tpu.core_type = #tpu.core_type<tc>, window_params = [{transform_indices = @transform_0, window_bounds = array<i64: 16, 128>}, {transform_indices = @transform_1, window_bounds = array<i64: 128, 128>}, {pipeline_mode = #tpu.pipeline_mode<synchronous>, transform_indices = @transform_2, window_bounds = array<i64: 1, 128>}, {pipeline_mode = #tpu.pipeline_mode<synchronous>, transform_indices = @transform_3, window_bounds = array<i64: 1, 128>}, {pipeline_mode = #tpu.pipeline_mode<synchronous>, transform_indices = @transform_4, window_bounds = array<i64: 1, 128>}, {transform_indices = @transform_5, window_bounds = array<i64: 16, 128>}]} {
    %c0_i32 = arith.constant 0 : i32
    %0 = arith.cmpi eq, %arg1, %c0_i32 : i32
    %1 = arith.extui %0 : i1 to i32
    %c0_i32_0 = arith.constant 0 : i32
    %2 = arith.cmpi ne, %1, %c0_i32_0 : i32
    scf.if %2 {
      %c0_10 = arith.constant 0 : index
      %c0_11 = arith.constant 0 : index
      %12 = vector.load %arg4[%c0_10, %c0_11] : memref<1x128xf32, #tpu.memory_space<vmem>>, vector<1x128xf32>
      %13 = vector.shape_cast %12 : vector<1x128xf32> to vector<1x128xf32>
      %14 = vector.broadcast %13 : vector<1x128xf32> to vector<16x128xf32>
      %c0_12 = arith.constant 0 : index
      %c0_13 = arith.constant 0 : index
      %15 = vector.load %arg8[%c0_12, %c0_13] : memref<16x128xf32, #tpu.memory_space<vmem>>, vector<16x128xf32>
      tpu.vector_store %arg8[%c0_12, %c0_13], %14 {strides = array<i32>} : memref<16x128xf32, #tpu.memory_space<vmem>>, vector<16x128xf32>,
    } else {
    }
    %c0 = arith.constant 0 : index
    %c0_1 = arith.constant 0 : index
    %3 = vector.load %arg8[%c0, %c0_1] : memref<16x128xf32, #tpu.memory_space<vmem>>, vector<16x128xf32>
    %c0_2 = arith.constant 0 : index
    %c0_3 = arith.constant 0 : index
    %4 = vector.load %arg2[%c0_2, %c0_3] : memref<16x128xf32, #tpu.memory_space<vmem>>, vector<16x128xf32>
    %c0_4 = arith.constant 0 : index
    %c0_5 = arith.constant 0 : index
    %5 = vector.load %arg3[%c0_4, %c0_5] : memref<128x128xf32, #tpu.memory_space<vmem>>, vector<128x128xf32>
    %cst = arith.constant dense<0.000000e+00> : vector<16x128xf32>
    %6 = tpu.matmul %4, %5, %cst {dimension_numbers = #tpu.dot_dimension_numbers<[1], [1], [0], [0], [0, 0, 1, 0], [], []>} : vector<16x128xf32>, vector<128x128xf32>, vector<16x128xf32> -> vector<16x128xf32>
    %7 = arith.addf %3, %6 : vector<16x128xf32>
    %c0_6 = arith.constant 0 : index
    %c0_7 = arith.constant 0 : index
    %8 = vector.load %arg8[%c0_6, %c0_7] : memref<16x128xf32, #tpu.memory_space<vmem>>, vector<16x128xf32>
    tpu.vector_store %arg8[%c0_6, %c0_7], %7 {strides = array<i32>} : memref<16x128xf32, #tpu.memory_space<vmem>>, vector<16x128xf32>,
    %c0_i32_8 = arith.constant 0 : i32
    %9 = arith.cmpi eq, %arg1, %c0_i32_8 : i32
    %10 = arith.extui %9 : i1 to i32
    %c0_i32_9 = arith.constant 0 : i32
    %11 = arith.cmpi ne, %10, %c0_i32_9 : i32
    scf.if %11 {
      %c0_10 = arith.constant 0 : index
      %c0_11 = arith.constant 0 : index
      %12 = vector.load %arg8[%c0_10, %c0_11] : memref<16x128xf32, #tpu.memory_space<vmem>>, vector<16x128xf32>
      %cst_12 = arith.constant dense<0.000000e+00> : vector<16xf32>
      %13 = vector.multi_reduction <add>, %12, %cst_12 [1] : vector<16x128xf32> to vector<16xf32>
      %14 = vector.shape_cast %13 : vector<16xf32> to vector<16x1xf32>
      %cst_13 = arith.constant 3.125000e-02 : f32
      %15 = vector.broadcast %cst_13 : f32 to vector<16x1xf32>
      %16 = arith.mulf %14, %15 : vector<16x1xf32>
      %17 = vector.broadcast %16 : vector<16x1xf32> to vector<16x128xf32>
      %18 = arith.subf %12, %17 : vector<16x128xf32>
      %19 = tpu.iota {dimensions = array<i32: 1>} : vector<16x128xi32>
      %c32_i32 = arith.constant 32 : i32
      %20 = vector.broadcast %c32_i32 : i32 to vector<16x128xi32>
      %21 = arith.cmpi slt, %19, %20 : vector<16x128xi32>
      %cst_14 = arith.constant 0.000000e+00 : f32
      %22 = vector.broadcast %cst_14 : f32 to vector<16x128xf32>
      %23 = arith.select %21, %18, %22 : vector<16x128xi1>, vector<16x128xf32>
      %24 = arith.mulf %23, %23 : vector<16x128xf32>
      %cst_15 = arith.constant dense<0.000000e+00> : vector<16xf32>
      %25 = vector.multi_reduction <add>, %24, %cst_15 [1] : vector<16x128xf32> to vector<16xf32>
      %26 = vector.shape_cast %25 : vector<16xf32> to vector<16x1xf32>
      %cst_16 = arith.constant 3.125000e-02 : f32
      %27 = vector.broadcast %cst_16 : f32 to vector<16x1xf32>
      %28 = arith.mulf %26, %27 : vector<16x1xf32>
      %cst_17 = arith.constant 9.99999974E-6 : f32
      %29 = vector.broadcast %cst_17 : f32 to vector<16x1xf32>
      %30 = arith.addf %28, %29 : vector<16x1xf32>
      %31 = math.rsqrt %30 : vector<16x1xf32>
      %32 = vector.broadcast %31 : vector<16x1xf32> to vector<16x128xf32>
      %33 = arith.mulf %18, %32 : vector<16x128xf32>
      %c0_18 = arith.constant 0 : index
      %c0_19 = arith.constant 0 : index
      %34 = vector.load %arg5[%c0_18, %c0_19] : memref<1x128xf32, #tpu.memory_space<vmem>>, vector<1x128xf32>
      %35 = vector.broadcast %34 : vector<1x128xf32> to vector<16x128xf32>
      %36 = arith.mulf %33, %35 : vector<16x128xf32>
      %c0_20 = arith.constant 0 : index
      %c0_21 = arith.constant 0 : index
      %37 = vector.load %arg6[%c0_20, %c0_21] : memref<1x128xf32, #tpu.memory_space<vmem>>, vector<1x128xf32>
      %38 = vector.broadcast %37 : vector<1x128xf32> to vector<16x128xf32>
      %39 = arith.addf %36, %38 : vector<16x128xf32>
      %cst_22 = arith.constant 0.000000e+00 : f32
      %40 = vector.broadcast %cst_22 : f32 to vector<16x128xf32>
      %41 = arith.maximumf %39, %40 : vector<16x128xf32>
      %c0_23 = arith.constant 0 : index
      %c0_24 = arith.constant 0 : index
      %42 = vector.load %arg7[%c0_23, %c0_24] : memref<16x128xf32, #tpu.memory_space<vmem>>, vector<16x128xf32>
      tpu.vector_store %arg7[%c0_23, %c0_24], %41 {strides = array<i32>} : memref<16x128xf32, #tpu.memory_space<vmem>>, vector<16x128xf32>,
    } else {
    }
    return
  }
  func.func @transform_0(%arg0: i32, %arg1: i32) -> (i32, i32) {
    %c0_i32 = arith.constant 0 : i32
    return %arg0, %arg1 : i32, i32
  }
  func.func @transform_1(%arg0: i32, %arg1: i32) -> (i32, i32) {
    %c0_i32 = arith.constant 0 : i32
    %c0_i32_0 = arith.constant 0 : i32
    return %c0_i32, %arg1 : i32, i32
  }
  func.func @transform_2(%arg0: i32, %arg1: i32) -> (i32, i32) {
    %c0_i32 = arith.constant 0 : i32
    %c0_i32_0 = arith.constant 0 : i32
    %c0_i32_1 = arith.constant 0 : i32
    return %c0_i32, %c0_i32_0 : i32, i32
  }
  func.func @transform_3(%arg0: i32, %arg1: i32) -> (i32, i32) {
    %c0_i32 = arith.constant 0 : i32
    %c0_i32_0 = arith.constant 0 : i32
    %c0_i32_1 = arith.constant 0 : i32
    return %c0_i32, %c0_i32_0 : i32, i32
  }
  func.func @transform_4(%arg0: i32, %arg1: i32) -> (i32, i32) {
    %c0_i32 = arith.constant 0 : i32
    %c0_i32_0 = arith.constant 0 : i32
    %c0_i32_1 = arith.constant 0 : i32
    return %c0_i32, %c0_i32_0 : i32, i32
  }
  func.func @transform_5(%arg0: i32, %arg1: i32) -> (i32, i32) {
    %c0_i32 = arith.constant 0 : i32
    %c0_i32_0 = arith.constant 0 : i32
    return %arg0, %c0_i32 : i32, i32
  }
}

</mosaic_0001>

<bundles_post_ra>
// kernel: dense_forward.1
= control target key start
LH: loop header
LB: loop body
LE: loop exit
PB: predicated region body
PF: predicated region fallthrough
CT: control target
= control target key end

     0   :  { %v145_v31 = vlaneseq  ;;  %s381_s1 = inlined_call_operand.vmem [shape: f32[128,128], index: 1, kind: input, shape index: {}]   ;;  %s382_s0 = inlined_call_operand.vmem [shape: f32[16,128], index: 0, kind: input, shape index: {}]   ;;  %s383_s2 = inlined_call_operand.vmem [shape: f32[1,128], index: 2, kind: input, shape index: {}]   ;;  %s384_s3 = inlined_call_operand.vmem [shape: f32[1,128], index: 3, kind: input, shape index: {}]   ;;  %s385_s4 = inlined_call_operand.vmem [shape: f32[1,128], index: 4, kind: input, shape index: {}]   ;;  %s386_s5 = inlined_call_operand.vmem [shape: f32[16,128], index: 5, kind: output, shape index: {}]  }
   0x1   :  { %v37_v0 = vld [vmem:[%s381_s1] sm:$0xff]  ;;  %v38_v1 = vld [vmem:[%s381_s1 + $0x8] sm:$0xff]  ;;  %v39_v2 = vld [vmem:[%s381_s1 + $0x10] sm:$0xff] }
   0x2   :  { %v246_v3 = vpack.c.bf16 %v38_v1, %v37_v0  ;;  %v40_v4 = vld [vmem:[%s381_s1 + $0x18] sm:$0xff]  ;;  %v35_v6 = vld [vmem:[%s382_s0] sm:$0xff]  ;;  %v42_v8 = vld [vmem:[%s381_s1 + $0x28] sm:$0xff]  ;;  %v146_v32 = vand.u32 127, %v145_v31 }
   0x3   :  { %v250_v5 = vpack.c.bf16 %v40_v4, %v39_v2  ;;  %v41_v7 = vld [vmem:[%s381_s1 + $0x20] sm:$0xff]  ;;  %243 = vmatprep.mubr.f32.mxu0 %v35_v6  ;;  %v43_v10 = vld [vmem:[%s381_s1 + $0x30] sm:$0xff]  ;;  %v44_v11 = vld [vmem:[%s381_s1 + $0x38] sm:$0xff] }
   0x4   :  { %247 = vmatprep.subr.bf16.mxu0 %v246_v3  ;;  %v254_v9 = vpack.c.bf16 %v42_v8, %v41_v7  ;;  %v258_v12 = vpack.c.bf16 %v44_v11, %v43_v10  ;;  %v45_v13 = vld [vmem:[%s381_s1 + $0x40] sm:$0xff]  ;;  %v46_v14 = vld [vmem:[%s381_s1 + $0x48] sm:$0xff]  ;;  %v47_v16 = vld [vmem:[%s381_s1 + $0x50] sm:$0xff]  ;;  %vm147_vm0 = vcmp.lt.s32.totalorder %v146_v32, 32 }
   0x5   :  { %249 = vmatpush3.bf16.xpose.msra.mxu0 %v246_v3  ;;  %v262_v15 = vpack.c.bf16 %v46_v14, %v45_v13  ;;  %v48_v17 = vld [vmem:[%s381_s1 + $0x58] sm:$0xff]  ;;  %v49_v19 = vld [vmem:[%s381_s1 + $0x60] sm:$0xff]  ;;  %v50_v20 = vld [vmem:[%s381_s1 + $0x68] sm:$0xff] }
   0x6   :  { %251 = vmatprep.subr.bf16.mxu0 %v250_v5  ;;  %v266_v18 = vpack.c.bf16 %v48_v17, %v47_v16  ;;  %v270_v21 = vpack.c.bf16 %v50_v20, %v49_v19  ;;  %v51_v22 = vld [vmem:[%s381_s1 + $0x70] sm:$0xff]  ;;  %v52_v23 = vld [vmem:[%s381_s1 + $0x78] sm:$0xff]  ;;  %v36_v25 = vld [vmem:[%s382_s0 + $0x8] sm:$0xff] }
   0x7   :  { %v274_v24 = vpack.c.bf16 %v52_v23, %v51_v22  ;;  %v190_v26 = vld [vmem:[%s383_s2] ss:$0 sm:$0xff] }
   0x8   :  { %v191_v50 = vld [vmem:[%s384_s3] ss:$0 sm:$0xff] }
   0x9   :  { %v192_v52 = vld [vmem:[%s385_s4] ss:$0 sm:$0xff] }
   0xd   :  { %253 = vmatpush3.bf16.xpose.msra.mxu0 %v250_v5 }
   0xe   :  { %255 = vmatprep.subr.bf16.mxu0 %v254_v9 }
  0x15   :  { %257 = vmatpush3.bf16.xpose.msra.mxu0 %v254_v9 }
  0x16   :  { %259 = vmatprep.subr.bf16.mxu0 %v258_v12 }
  0x1d   :  { %261 = vmatpush3.bf16.xpose.msra.mxu0 %v258_v12 }
  0x1e   :  { %263 = vmatprep.subr.bf16.mxu0 %v262_v15 }
  0x25   :  { %265 = vmatpush3.bf16.xpose.msra.mxu0 %v262_v15 }
  0x26   :  { %267 = vmatprep.subr.bf16.mxu0 %v266_v18 }
  0x2d   :  { %269 = vmatpush3.bf16.xpose.msra.mxu0 %v266_v18 }
  0x2e   :  { %271 = vmatprep.subr.bf16.mxu0 %v270_v21 }
  0x35   :  { %273 = vmatpush3.bf16.xpose.msra.mxu0 %v270_v21 }
  0x36   :  { %275 = vmatprep.subr.bf16.mxu0 %v274_v24 }
  0x3d   :  { %277 = vmatpush3.bf16.xpose.msra.mxu0 %v274_v24 }
  0x44   :  { %244 = vmatmul.mubr.f32.vlgmr.msra.gmra.mrb[0].mxu0 %v36_v25 }
 0x117   :  { %v245_v27 = vpop.f32.mrb[0].mxu0 }
 0x118   :  { %v119_v28 = vpop.f32.mrb[1].mxu0  ;;  %v129_v30 = vadd.f32 %v245_v27, %v190_v26 }
 0x119   :  { %v128_v29 = vadd.f32 %v190_v26, %v119_v28 }
 0x11b   :  { %137 = vadd.xlane.f32.xlu0 %v128_v29 }
 0x11f   :  { %139 = vadd.xlane.f32.xlu0 %v129_v30 }
 0x1a8   :  { %v138_v33 = vpop.xlane.xlu0 %137 }
 0x1a9   :  { %v141_v34 = vmul.f32 0.03125, %v138_v33 }
 0x1ab   :  { %v143_v35 = vsub.f32 %v128_v29, %v141_v34 }
 0x1ac   :  { %v140_v36 = vpop.xlane.xlu0 %139 }
 0x1ad   :  { %v142_v37 = vmul.f32 0.03125, %v140_v36  ;;  %v148_v38 = vsel %vm147_vm0, %v143_v35, 0.0 }
 0x1ae   :  { %v150_v39 = vmul.f32 %v148_v38, %v148_v38 }
 0x1af   :  { %v144_v40 = vsub.f32 %v129_v30, %v142_v37 }
 0x1b0   :  { %152 = vadd.xlane.f32.xlu1 %v150_v39 }
 0x1b1   :  { %v149_v41 = vsel %vm147_vm0, %v144_v40, 0.0 }
 0x1b2   :  { %v151_v42 = vmul.f32 %v149_v41, %v149_v41 }
 0x1b4   :  { %154 = vadd.xlane.f32.xlu1 %v151_v42 }
 0x23d   :  { %v153_v43 = vpop.xlane.xlu1 %152 }
 0x23e   :  { %v156_v44 = vmul.f32 0.03125, %v153_v43 }
 0x240   :  { %v158_v45 = vadd.f32 1e-05, %v156_v44 }
 0x241   :  { %v155_v46 = vpop.xlane.xlu1 %154 }
 0x242   :  { %278 = vrsqrt.f32 %v158_v45  ;;  %v157_v47 = vmul.f32 0.03125, %v155_v46 }
 0x244   :  { %v159_v48 = vadd.f32 1e-05, %v157_v47 }
 0x246   :  { %280 = vrsqrt.f32 %v159_v48 }
 0x24c   :  { %v279_v49 = vpop.eup %278 }
 0x24d   :  { %v162_v51 = vmul.f32 %v279_v49, %v143_v35 }
 0x24f   :  { %v171_v53 = vmul.f32 %v191_v50, %v162_v51 }
 0x250   :  { %v281_v54 = vpop.eup %280 }
 0x251   :  { %v180_v55 = vadd.f32 %v192_v52, %v171_v53  ;;  %v163_v56 = vmul.f32 %v281_v54, %v144_v40 }
 0x253   :  { %v182_v57 = vmax.f32 %v180_v55, 0.0  ;;  %v172_v58 = vmul.f32 %v191_v50, %v163_v56 }
 0x255   :  { %184 = vst [vmem:[%s386_s5] sm:$0xff] %v182_v57  ;;  %v181_v59 = vadd.f32 %v192_v52, %v172_v58 }
 0x257   :  { %v183_v60 = vmax.f32 %v181_v59, 0.0 }
 0x259   :  { %185 = vst [vmem:[%s386_s5 + $0x8] sm:$0xff] %v183_v60 }

</bundles_post_ra>
